<compile_context>
chip_gen: v6e
topology: v6e:2x2x1
jax: 0.10.0
libtpu: 0.0.40
codegen_flags: <defaults>
</compile_context>

<pallas_src>
import jax
import jax.numpy as jnp
from jax.experimental import pallas as pl
from jax.experimental.pallas import tpu as pltpu

_LANE = 128   # lane width (last dim)
_SUB = 8      # sublane width (second-to-last dim)


def _fusion_classifier_kernel(x_ref, w_ref, b_ref, o_ref):
    # x_ref: (TM, Kp)  w_ref: (Kp, Np)  b_ref: (1, Np)  o_ref: (TM, Np)
    x = x_ref[...]
    w = w_ref[...]
    b = b_ref[...]
    logits = jnp.dot(x, w, preferred_element_type=jnp.float32) + b
    # jax.nn.sigmoid lowers to the EUP logistic path (free slot vs. VALU divide).
    o_ref[...] = jax.nn.sigmoid(logits).astype(o_ref.dtype)


def fusion_classifier(x, weight, bias, *, tm_max=512):
    """Computes sigmoid(x @ weight.T + bias), matching nn.Linear + Sigmoid.

    x:      (B, input_size)
    weight: (output_size, input_size)   -- nn.Linear layout
    bias:   (output_size,)
    """
    B, K = x.shape
    N = weight.shape[0]

    # Pad contraction dim and output dim to lane multiples; pad batch to a
    # sublane multiple and then to a multiple of the batch tile TM.
    Kp = max(_LANE, pl.cdiv(K, _LANE) * _LANE)
    Np = max(_LANE, pl.cdiv(N, _LANE) * _LANE)
    Bp = pl.cdiv(B, _SUB) * _SUB
    TM = min(tm_max, Bp)
    Bp = pl.cdiv(Bp, TM) * TM

    x_p = jnp.zeros((Bp, Kp), x.dtype).at[:B, :K].set(x)
    w_t = jnp.zeros((Kp, Np), weight.dtype).at[:K, :N].set(weight.T)
    b2d = jnp.zeros((1, Np), bias.dtype).at[0, :N].set(bias)

    grid = (Bp // TM,)
    out = pl.pallas_call(
        _fusion_classifier_kernel,
        out_shape=jax.ShapeDtypeStruct((Bp, Np), x.dtype),
        grid=grid,
        in_specs=[
            pl.BlockSpec((TM, Kp), lambda i: (i, 0)),   # x tile, pipelined over batch
            pl.BlockSpec((Kp, Np), lambda i: (0, 0)),   # W resident in VMEM
            pl.BlockSpec((1, Np), lambda i: (0, 0)),    # bias resident in VMEM
        ],
        out_specs=pl.BlockSpec((TM, Np), lambda i: (i, 0)),
        compiler_params=pltpu.CompilerParams(
            dimension_semantics=("parallel",),          # megacore-shardable on v7x
            vmem_limit_bytes=32 << 20,                  # fits v7x's scoped VMEM
        ),
    )(x_p, w_t, b2d)

    # Slice away the lane / batch padding outside the kernel.
    return out[:B, :N]


if __name__ == "__main__":
    key = jax.random.PRNGKey(0)
    k_x, k_w, k_b = jax.random.split(key, 3)

    batch = 8
    input_size = 32
    output_size = 16

    # Deterministic synthetic parameters (nn.Linear(input_size, output_size)):
    # weight (output_size, input_size), bias (output_size,)
    bound = 1.0 / jnp.sqrt(jnp.float32(input_size))
    weight = jax.random.uniform(
        k_w, (output_size, input_size), jnp.float32, -bound, bound)
    bias = jax.random.uniform(
        k_b, (output_size,), jnp.float32, -bound, bound)

    x = jax.random.normal(k_x, (batch, input_size), jnp.float32)

    out = fusion_classifier(x, weight, bias)
    jax.block_until_ready(out)

    # Reference check against plain JAX (same math as torch Linear + Sigmoid).
    ref = jax.nn.sigmoid(x @ weight.T + bias)
    assert out.shape == (batch, output_size)
    assert jnp.allclose(out, ref, atol=1e-5, rtol=1e-5)

    print("KERNEL_OK")
</pallas_src>

<mosaic_0001>
module attributes {stable_mosaic.version = 11 : i64} {
  func.func @_fusion_classifier_kernel(%arg0: i32, %arg1: memref<8x128xf32, #tpu.memory_space<vmem>>, %arg2: memref<128x128xf32, #tpu.memory_space<vmem>>, %arg3: memref<1x128xf32, #tpu.memory_space<vmem>>, %arg4: memref<8x128xf32, #tpu.memory_space<vmem>>) attributes {dimension_semantics = [#tpu.dimension_semantics<parallel>], iteration_bounds = array<i64: 1>, scalar_prefetch = 0 : i64, scratch_operands = 0 : i64, tpu.core_type = #tpu.core_type<tc>, window_params = [{transform_indices = @transform_0, window_bounds = array<i64: 8, 128>}, {pipeline_mode = #tpu.pipeline_mode<synchronous>, transform_indices = @transform_1, window_bounds = array<i64: 128, 128>}, {pipeline_mode = #tpu.pipeline_mode<synchronous>, transform_indices = @transform_2, window_bounds = array<i64: 1, 128>}, {transform_indices = @transform_3, window_bounds = array<i64: 8, 128>}]} {
    %c0 = arith.constant 0 : index
    %c0_0 = arith.constant 0 : index
    %0 = vector.load %arg1[%c0, %c0_0] : memref<8x128xf32, #tpu.memory_space<vmem>>, vector<8x128xf32>
    %c0_1 = arith.constant 0 : index
    %c0_2 = arith.constant 0 : index
    %1 = vector.load %arg2[%c0_1, %c0_2] : memref<128x128xf32, #tpu.memory_space<vmem>>, vector<128x128xf32>
    %c0_3 = arith.constant 0 : index
    %c0_4 = arith.constant 0 : index
    %2 = vector.load %arg3[%c0_3, %c0_4] : memref<1x128xf32, #tpu.memory_space<vmem>>, vector<1x128xf32>
    %cst = arith.constant dense<0.000000e+00> : vector<8x128xf32>
    %3 = tpu.matmul %0, %1, %cst {dimension_numbers = #tpu.dot_dimension_numbers<[1], [0], [0], [1], [0, 0, 1, 1], [], []>} : vector<8x128xf32>, vector<128x128xf32>, vector<8x128xf32> -> vector<8x128xf32>
    %4 = vector.broadcast %2 : vector<1x128xf32> to vector<8x128xf32>
    %5 = arith.addf %3, %4 : vector<8x128xf32>
    %6 = arith.negf %5 : vector<8x128xf32>
    %7 = math.exp %6 : vector<8x128xf32>
    %cst_5 = arith.constant 1.000000e+00 : f32
    %8 = vector.broadcast %cst_5 : f32 to vector<8x128xf32>
    %9 = arith.addf %8, %7 : vector<8x128xf32>
    %10 = arith.divf %8, %9 : vector<8x128xf32>
    %c0_6 = arith.constant 0 : index
    %c0_7 = arith.constant 0 : index
    %11 = vector.load %arg4[%c0_6, %c0_7] : memref<8x128xf32, #tpu.memory_space<vmem>>, vector<8x128xf32>
    tpu.vector_store %arg4[%c0_6, %c0_7], %10 {strides = array<i32>} : memref<8x128xf32, #tpu.memory_space<vmem>>, vector<8x128xf32>,
    return
  }
  func.func @transform_0(%arg0: i32) -> (i32, i32) {
    %c0_i32 = arith.constant 0 : i32
    %c0_i32_0 = arith.constant 0 : i32
    return %arg0, %c0_i32 : i32, i32
  }
  func.func @transform_1(%arg0: i32) -> (i32, i32) {
    %c0_i32 = arith.constant 0 : i32
    %c0_i32_0 = arith.constant 0 : i32
    %c0_i32_1 = arith.constant 0 : i32
    return %c0_i32, %c0_i32_0 : i32, i32
  }
  func.func @transform_2(%arg0: i32) -> (i32, i32) {
    %c0_i32 = arith.constant 0 : i32
    %c0_i32_0 = arith.constant 0 : i32
    %c0_i32_1 = arith.constant 0 : i32
    return %c0_i32, %c0_i32_0 : i32, i32
  }
  func.func @transform_3(%arg0: i32) -> (i32, i32) {
    %c0_i32 = arith.constant 0 : i32
    %c0_i32_0 = arith.constant 0 : i32
    return %arg0, %c0_i32 : i32, i32
  }
}

</mosaic_0001>

<bundles_post_ra>
// kernel: tpu_custom_call.1
= control target key start
LH: loop header
LB: loop body
LE: loop exit
PB: predicated region body
PF: predicated region fallthrough
CT: control target
= control target key end

     0   :  { %8 = vsyncpa [#allocation3], 0  ;;  %s328_s0 = inlined_call_operand.hbm [shape: f32[8,128], index: 0, kind: input, shape index: {}]   ;;  %s329_s1 = inlined_call_operand.hbm [shape: f32[128,128], index: 1, kind: input, shape index: {}]   ;;  %s330_s2 = inlined_call_operand.vmem [shape: f32[1,128], index: 2, kind: input, shape index: {}]   ;;  %s331_s3 = inlined_call_operand.hbm [shape: f32[8,128], index: 3, kind: output, shape index: {}]  }
   0x1   :  { %9 = vsyncpa [#allocation6], 0 }
   0x2   :  { %10 = vsyncpa [#allocation4], 0  ;;  %s289_s12 = smov [#allocation2]   ;;  %s290_s14 = smov [#allocation5]  }
   0x3   :  { %s17_s13 = sshll.u32 %s289_s12, 4  ;;  %s26_s15 = sshll.u32 %s290_s14, 4  ;;  %s18_s13 = int_to_ptr.vmem [resolvable:$true] %s17_s13  ;;  %s27_s15 = int_to_ptr.vmem [resolvable:$true] %s26_s15 }
   0x4   :  { %s231_s16 = scalar_lea.vmem %s18_s13, 128  ;;  %p236_p1 = scmp.lt.s32.totalorder %s18_s13, %s18_s13 }
   0x5   :  { %p232_p0 = scmp.ne.s32.totalorder %s18_s13, %s231_s16  ;;  %p237_p2 = scmp.lt.s32.totalorder %s231_s16, %s231_s16 }
   0x7   :  { %p238_p3 = por %p237_p2, %p236_p1 }
   0x9   :  { %p239_p4 = pnand %p238_p3, %p232_p0 }
   0xb   :  { %242 = shalt.err (!%p239_p4)
}
   0xc   :  { %20 = dma.hbm_to_vmem [thread:$0]  %s328_s0, 128, %s18_s13, [#allocation3]  }
   0xd   :  { %s251_s19 = scalar_lea.vmem %s27_s15, 2048  ;;  %p256_p6 = scmp.lt.s32.totalorder %s27_s15, %s27_s15 }
   0xe   :  { %p252_p5 = scmp.ne.s32.totalorder %s27_s15, %s251_s19  ;;  %p257_p7 = scmp.lt.s32.totalorder %s251_s19, %s251_s19 }
  0x10   :  { %p258_p8 = por %p257_p7, %p256_p6 }
  0x12   :  { %p259_p9 = pnand %p258_p8, %p252_p5 }
  0x14   :  { %262 = shalt.err (!%p259_p9)
}
  0x15   :  { %s291_s20 = smov 128   ;;  %s292_s21 = smov 8  }
  0x16   :  { %32 = dma.hbm_to_vmem [thread:$0]  %s329_s1, 2048, %s27_s15, [#allocation6], %s291_s20, %s291_s20, %s292_s21  }
  0x17   :  { %283 = dma.done.wait [#allocation3], 128  }
  0x18   :  { %284 = vsyncadd [#allocation3], 4294967168 }
  0x19   :  { %285 = dma.done.wait [#allocation6], 2048  }
  0x1a   :  { %286 = vsyncadd [#allocation6], 4294965248  ;;  %v293_v0 = vmov 0.0   ;;  %vm294_vm0 = vmmov 0   ;;  %v57_v1 = vld [vmem:[#allocation5 + $0x78] sm:$0xff]  ;;  %v56_v2 = vld [vmem:[#allocation5 + $0x70] sm:$0xff] }
  0x1b   :  { %177 = vmatprep.subr.mxu0 %v293_v0  ;;  %209 = vmatprep.mubr.msk.f32.mxu0 %vm294_vm0, %v293_v0  ;;  %v55_v3 = vld [vmem:[#allocation5 + $0x68] sm:$0xff]  ;;  %v54_v4 = vld [vmem:[#allocation5 + $0x60] sm:$0xff]  ;;  %v53_v5 = vld [vmem:[#allocation5 + $0x58] sm:$0xff]  ;;  %s295_s24 = smov [#allocation7]  }
  0x1c   :  { %178 = vmatpush3.msra.mxu0 %v57_v1  ;;  %v52_v6 = vld [vmem:[#allocation5 + $0x50] sm:$0xff]  ;;  %v51_v7 = vld [vmem:[#allocation5 + $0x48] sm:$0xff]  ;;  %v50_v8 = vld [vmem:[#allocation5 + $0x40] sm:$0xff]  ;;  %s148_s25 = sshll.u32 %s295_s24, 4  ;;  %s149_s25 = int_to_ptr.vmem [resolvable:$true] %s148_s25 }
  0x1d   :  { %179 = vmatprep.subr.mxu0 %v293_v0  ;;  %v49_v9 = vld [vmem:[#allocation5 + $0x38] sm:$0xff]  ;;  %v48_v10 = vld [vmem:[#allocation5 + $0x30] sm:$0xff]  ;;  %v47_v11 = vld [vmem:[#allocation5 + $0x28] sm:$0xff]  ;;  %s263_s26 = scalar_lea.vmem %s149_s25, 128  ;;  %p268_p11 = scmp.lt.s32.totalorder %s149_s25, %s149_s25 }
  0x1e   :  { %180 = vmatpush3.msra.mxu0 %v56_v2  ;;  %v46_v12 = vld [vmem:[#allocation5 + $0x20] sm:$0xff]  ;;  %v45_v13 = vld [vmem:[#allocation5 + $0x18] sm:$0xff]  ;;  %v44_v14 = vld [vmem:[#allocation5 + $0x10] sm:$0xff]  ;;  %p264_p10 = scmp.ne.s32.totalorder %s149_s25, %s263_s26  ;;  %p269_p12 = scmp.lt.s32.totalorder %s263_s26, %s263_s26 }
  0x1f   :  { %181 = vmatprep.subr.mxu0 %v293_v0  ;;  %v43_v15 = vld [vmem:[#allocation5 + $0x8] sm:$0xff]  ;;  %v42_v16 = vld [vmem:[#allocation5] sm:$0xff]  ;;  %v41_v17 = vld [vmem:[#allocation2] sm:$0xff] }
  0x20   :  { %182 = vmatpush3.msra.mxu0 %v55_v3  ;;  %v158_v18 = vld [vmem:[%s330_s2] ss:$0 sm:$0xff]  ;;  %p270_p13 = por %p269_p12, %p268_p11 }
  0x21   :  { %183 = vmatprep.subr.mxu0 %v293_v0 }
  0x22   :  { %184 = vmatpush3.msra.mxu0 %v54_v4  ;;  %p271_p0 = pnand %p270_p13, %p264_p10 }
  0x23   :  { %185 = vmatprep.subr.mxu0 %v293_v0 }
  0x24   :  { %186 = vmatpush3.msra.mxu0 %v53_v5 }
  0x25   :  { %187 = vmatprep.subr.mxu0 %v293_v0 }
  0x26   :  { %188 = vmatpush3.msra.mxu0 %v52_v6 }
  0x27   :  { %189 = vmatprep.subr.mxu0 %v293_v0 }
  0x28   :  { %190 = vmatpush3.msra.mxu0 %v51_v7 }
  0x29   :  { %191 = vmatprep.subr.mxu0 %v293_v0 }
  0x2a   :  { %192 = vmatpush3.msra.mxu0 %v50_v8 }
  0x2b   :  { %193 = vmatprep.subr.mxu0 %v293_v0 }
  0x2c   :  { %194 = vmatpush3.msra.mxu0 %v49_v9 }
  0x2d   :  { %195 = vmatprep.subr.mxu0 %v293_v0 }
  0x2e   :  { %196 = vmatpush3.msra.mxu0 %v48_v10 }
  0x2f   :  { %197 = vmatprep.subr.mxu0 %v293_v0 }
  0x30   :  { %198 = vmatpush3.msra.mxu0 %v47_v11 }
  0x31   :  { %199 = vmatprep.subr.mxu0 %v293_v0 }
  0x32   :  { %200 = vmatpush3.msra.mxu0 %v46_v12 }
  0x33   :  { %201 = vmatprep.subr.mxu0 %v293_v0 }
  0x34   :  { %202 = vmatpush3.msra.mxu0 %v45_v13 }
  0x35   :  { %203 = vmatprep.subr.mxu0 %v293_v0 }
  0x36   :  { %204 = vmatpush3.msra.mxu0 %v44_v14 }
  0x37   :  { %205 = vmatprep.subr.mxu0 %v293_v0 }
  0x38   :  { %206 = vmatpush3.msra.mxu0 %v43_v15 }
  0x39   :  { %207 = vmatprep.subr.mxu0 %v293_v0 }
  0x3a   :  { %208 = vmatpush3.msra.mxu0 %v42_v16 }
  0x3b   :  { %210 = vmatmul.mubr.f32.vlgmr.msra.gmra.mxu0 %v41_v17 }
  0xfb   :  { %v131_v19 = vpop.f32.mrf.mxu0 }
  0xfc   :  { %v132_v20 = vadd.f32 %v158_v18, %v131_v19 }
  0xfd   :  { %v211_v21 = vpop.f32.mrf.mxu0 }
  0xfe   :  { %v159_v22 = vmul.f32 -1.442695, %v132_v20 }
 0x100   :  { %219 = vpow2.f32 %v159_v22 }
 0x10d   :  { %v220_v23 = vpop.eup %219 }
 0x10e   :  { %v138_v24 = vadd.f32 1.0, %v220_v23 }
 0x110   :  { %221 = vrcp.f32 %v138_v24 }
 0x11d   :  { %v222_v25 = vpop.eup %221 }
 0x11e   :  { %141 = vst [vmem:[#allocation7] sm:$0xff] %v222_v25 }
 0x11f   :  { %274 = shalt.err (!%p271_p0)
}
 0x120   :  { %151 = dma.vmem_to_hbm [thread:$0]  %s149_s25, 128, %s331_s3, [#allocation4]  }
 0x121   :  { %287 = dma.done.wait [#allocation4], 128  }
 0x122   :  { %288 = vsyncadd [#allocation4], 4294967168 }
 0x123   :  { %155 = vsyncpa [#allocation3], 1 }
 0x124   :  { %156 = vsyncpa [#allocation6], 1 }
 0x125   :  { %157 = vsyncpa [#allocation4], 1 }

</bundles_post_ra>
